<compile_context>
chip_gen: v5e
topology: v5e:2x2
jax: 0.10.0
libtpu: 0.0.40
codegen_flags: <defaults>
</compile_context>

<pallas_src>
import jax
import jax.numpy as jnp
from jax.experimental import pallas as pl
from jax.experimental.pallas import tpu as pltpu


def fold_bn(gamma, beta, mean, var, eps=1e-5):
    scale = gamma / jnp.sqrt(var + eps)
    bias = beta - mean * scale
    return scale, bias


def _round_up(a, m):
    return ((a + m - 1) // m) * m


def _pick_images_per_step(n, l1):
    """Largest divisor of n that keeps >=2 grid steps (v7x: 2 TCs) and a bounded lane extent."""
    best = 1
    min_steps = 2 if n >= 2 else 1
    for nb in range(1, n + 1):
        if n % nb:
            continue
        if n // nb < min_steps:
            continue
        if nb * l1 > 8192:          # keep slabs comfortably inside v7x's 64 MiB VMEM
            continue
        best = nb
    return best


def resblock_pallas(x, w1_oihw, s1, b1, w2_oihw, s2, b2, wr_oihw, sr, br):
    """x: (N, Cin, H, W) f32; conv weights in torch OIHW layout; folded BN scale/bias."""
    N, Cin, H, W = x.shape
    Cout = w1_oihw.shape[0]
    assert Cout % 8 == 0, "slab row offsets (k*Cout) must be sublane-aligned"

    f32, bf16 = jnp.float32, jnp.bfloat16

    Cp = _round_up(Cin, 8)           # pad input channels -> 8-row-aligned slab blocks
    Wf = W + 4                       # flattened row stride (width of the pad-2 image)
    L2 = H * Wf                      # conv2 / residual / output flat length
    SH = 2 * Wf + 2                  # largest im2col shift (kh = kw = 2)
    L1 = L2 + SH                     # conv1 output flat length (covers the pad-1 grid)
    Q = L1 + SH                      # flattened padded-input length
    # flat-shift im2col only valid for k=3 / stride=1 / pad=1 with >=2 zero separator columns
    assert Wf - W >= 2, "flat-shift im2col needs >=2 zero separator columns per row"

    Nb = _pick_images_per_step(N, L1)
    G = N // Nb

    # ---- input prep (layout plumbing only; fused by XLA) ----
    xpc = jnp.pad(x, ((0, 0), (0, Cp - Cin), (0, 0), (0, 0)))
    xp2 = jnp.pad(xpc, ((0, 0), (0, 0), (2, 2), (2, Wf - W - 2)))        # pad-2 image, width Wf
    xflat = xp2.reshape(N, Cp, (H + 4) * Wf)
    xflat = jnp.pad(xflat, ((0, 0), (0, 0), (0, Q - (H + 4) * Wf))).astype(bf16)   # (N, Cp, Q)

    # ---- weights: fold BN scale, im2col layout, bf16 ----
    w1p = jnp.pad(w1_oihw, ((0, 0), (0, Cp - Cin), (0, 0), (0, 0)))
    w1m = (jnp.transpose(w1p, (0, 2, 3, 1)).reshape(Cout, 9 * Cp) * s1[:, None]).astype(bf16)
    w2m = jnp.transpose(w2_oihw, (0, 2, 3, 1)).reshape(Cout, 9 * Cout) * s2[:, None]
    wrm = jnp.pad(wr_oihw[:, :, 0, 0], ((0, 0), (0, Cp - Cin))) * sr[:, None]
    w2rm = jnp.concatenate([w2m, wrm], axis=1).astype(bf16)              # (Cout, 9*Cout + Cp)
    bias = jnp.stack([b1, b2 + br], axis=0).astype(f32)[:, :, None]      # (2, Cout, 1)

    # halo mask: 1 on the H x W interior of the pad-1 grid, 0 on the padding ring / junk cols.
    # Pre-replicated to (Cout, Nb*L1) so the kernel epilogue is pure VALU (no sublane bcast).
    p_idx = jnp.arange(L1)
    a_idx, b_idx = p_idx // Wf, p_idx % Wf
    mask1 = ((a_idx >= 1) & (a_idx <= H) & (b_idx >= 1) & (b_idx <= W)).astype(f32)
    mask = jnp.ones((Cout, 1), f32) * jnp.tile(mask1, (Nb,))[None, :]    # (Cout, Nb*L1)

    shifts = [kh * Wf + kw for kh in range(3) for kw in range(3)]

    def kernel(xflat_ref, mask_ref, w1_ref, w2r_ref, b_ref,
               out_ref, slab1_ref, slab2_ref, y1_ref):
        # ---- conv1 im2col slab: ref -> ref copies, no full-activation vreg materialization ----
        for b in range(Nb):
            for k, s in enumerate(shifts):
                slab1_ref[k * Cp:(k + 1) * Cp, b * L1:(b + 1) * L1] = xflat_ref[b, :, s:s + L1]
            # residual 1x1-conv rows come straight from the padded image at shift SH
            slab2_ref[9 * Cout:9 * Cout + Cp, b * L2:(b + 1) * L2] = xflat_ref[b, :, SH:SH + L2]

        # ---- conv1 (3x3, BN1 scale pre-folded) as ONE MXU matmul ----
        acc1 = jnp.dot(w1_ref[...], slab1_ref[...],
                       preferred_element_type=jnp.float32)               # (Cout, Nb*L1) f32
        # BN1 bias + ReLU; the mask re-creates the zero padding ring conv2 expects.
        # Stored as bf16 in VMEM scratch (half the f32 footprint, deliberate spill).
        y1_ref[...] = (jnp.maximum(acc1 + b_ref[0], 0.0) * mask_ref[...]).astype(jnp.bfloat16)

        # ---- conv2 (3x3, BN2 scale folded) + residual 1x1 conv fused into ONE matmul ----
        for b in range(Nb):
            for k, s in enumerate(shifts):
                slab2_ref[k * Cout:(k + 1) * Cout, b * L2:(b + 1) * L2] = \
                    y1_ref[:, b * L1 + s:b * L1 + s + L2]
        y2 = jnp.dot(w2r_ref[...], slab2_ref[...],
                     preferred_element_type=jnp.float32) + b_ref[1]
        y2 = jnp.maximum(y2, 0.0)

        # lane-dense (Cout, L2) f32 stores (L2 = H*Wf >= 320 lanes)
        for b in range(Nb):
            out_ref[b] = y2[:, b * L2:(b + 1) * L2]

    # ---- VMEM budget derived from the actual (8,128)-padded buffer sizes ----
    def _tile_bytes(rows, cols, itemsize):
        return _round_up(rows, 8) * _round_up(cols, 128) * itemsize

    vmem_est = (
        2 * Nb * _tile_bytes(Cp, Q, 2)                     # xflat block (double buffered)
        + 2 * _tile_bytes(Cout, Nb * L1, 4)                # mask
        + 2 * _tile_bytes(Cout, 9 * Cp, 2)                 # conv1 weights
        + 2 * _tile_bytes(Cout, 9 * Cout + Cp, 2)          # conv2+res weights
        + 2 * 2 * _tile_bytes(Cout, 1, 4)                  # biases
        + 2 * Nb * _tile_bytes(Cout, L2, 4)                # output block (double buffered)
        + _tile_bytes(9 * Cp, Nb * L1, 2)                  # conv1 im2col slab
        + _tile_bytes(9 * Cout + Cp, Nb * L2, 2)           # conv2+res im2col slab
        + _tile_bytes(Cout, Nb * L1, 2)                    # y1 scratch
    )
    vmem_limit = int(min(max(2 * vmem_est + (4 << 20), 16 << 20), 64 << 20))

    out_flat = pl.pallas_call(
        kernel,
        out_shape=jax.ShapeDtypeStruct((N, Cout, L2), f32),
        grid_spec=pltpu.PrefetchScalarGridSpec(
            num_scalar_prefetch=0,
            grid=(G,),
            in_specs=[
                pl.BlockSpec((Nb, Cp, Q), lambda g: (g, 0, 0)),          # padded flat image(s)
                pl.BlockSpec((Cout, Nb * L1), lambda g: (0, 0)),         # halo mask (fetched once)
                pl.BlockSpec((Cout, 9 * Cp), lambda g: (0, 0)),          # conv1 weights
                pl.BlockSpec((Cout, 9 * Cout + Cp), lambda g: (0, 0)),   # conv2 + residual weights
                pl.BlockSpec((2, Cout, 1), lambda g: (0, 0, 0)),         # packed biases
            ],
            out_specs=pl.BlockSpec((Nb, Cout, L2), lambda g: (g, 0, 0)),
            scratch_shapes=[
                pltpu.VMEM((9 * Cp, Nb * L1), bf16),           # conv1 im2col slab
                pltpu.VMEM((9 * Cout + Cp, Nb * L2), bf16),    # conv2 + residual im2col slab
                pltpu.VMEM((Cout, Nb * L1), bf16),             # conv1 output (masked, bf16)
            ],
        ),
        compiler_params=pltpu.CompilerParams(
            dimension_semantics=("parallel",),
            vmem_limit_bytes=vmem_limit,
        ),
    )(xflat, mask, w1m, w2rm, bias)

    # un-flatten: (N, Cout, H*Wf) -> (N, Cout, H, W)   (already NCHW, no transpose needed)
    # TODO(synk): if the consumer accepts the Wf-padded layout this slice copy disappears.
    return out_flat.reshape(N, Cout, H, Wf)[:, :, :, :W]


def resblock_reference(x, w1_oihw, s1, b1, w2_oihw, s2, b2, wr_oihw, sr, br):
    """Pure-JAX reference mirroring the kernel numerics (bf16 operands, f32 accumulation)."""
    q = lambda a: a.astype(jnp.bfloat16)

    def conv(inp, w, pad):
        return jax.lax.conv_general_dilated(
            inp, w, window_strides=(1, 1), padding=((pad, pad), (pad, pad)),
            dimension_numbers=("NCHW", "OIHW", "NCHW"),
            preferred_element_type=jnp.float32)

    y = conv(q(x), q(w1_oihw * s1[:, None, None, None]), 1) + b1[None, :, None, None]
    y = q(jnp.maximum(y, 0.0))
    y = conv(y, q(w2_oihw * s2[:, None, None, None]), 1) + b2[None, :, None, None]
    res = conv(q(x), q(wr_oihw * sr[:, None, None, None]), 0) + br[None, :, None, None]
    return jnp.maximum(y + res, 0.0)


if __name__ == "__main__":
    # ResBlock(IN=4, OUT=8, S=1, change_channels=True), inference-mode BatchNorm
    N, Cin, Cout, H, W = 2, 4, 8, 16, 16

    key = jax.random.PRNGKey(0)
    ks = jax.random.split(key, 8)

    x = jax.random.normal(ks[0], (N, Cin, H, W), jnp.float32)
    w1_oihw = 0.1 * jax.random.normal(ks[1], (Cout, Cin, 3, 3), jnp.float32)
    w2_oihw = 0.1 * jax.random.normal(ks[2], (Cout, Cout, 3, 3), jnp.float32)
    wr_oihw = 0.1 * jax.random.normal(ks[3], (Cout, Cin, 1, 1), jnp.float32)

    def bn_params(k):
        k1, k2, k3, k4 = jax.random.split(k, 4)
        gamma = 1.0 + 0.1 * jax.random.normal(k1, (Cout,), jnp.float32)
        beta = 0.1 * jax.random.normal(k2, (Cout,), jnp.float32)
        mean = 0.05 * jax.random.normal(k3, (Cout,), jnp.float32)
        var = 0.5 + jax.random.uniform(k4, (Cout,), jnp.float32)
        return fold_bn(gamma, beta, mean, var)

    s1, b1 = bn_params(ks[4])
    s2, b2 = bn_params(ks[5])
    sr, br = bn_params(ks[6])

    out = jax.jit(resblock_pallas)(x, w1_oihw, s1, b1, w2_oihw, s2, b2, wr_oihw, sr, br)
    out = jax.block_until_ready(out)

    ref = resblock_reference(x, w1_oihw, s1, b1, w2_oihw, s2, b2, wr_oihw, sr, br)
    assert out.shape == (N, Cout, H, W)
    err = float(jnp.max(jnp.abs(out - ref)))
    assert err < 5e-3, f"mismatch vs reference: max abs err = {err}"

    print("KERNEL_OK")
</pallas_src>

<mosaic_0001>
module attributes {stable_mosaic.version = 11 : i64} {
  func.func @kernel(%arg0: i32, %arg1: memref<1x8x404xbf16, #tpu.memory_space<vmem>>, %arg2: memref<8x362xf32, #tpu.memory_space<vmem>>, %arg3: memref<8x72xbf16, #tpu.memory_space<vmem>>, %arg4: memref<8x80xbf16, #tpu.memory_space<vmem>>, %arg5: memref<2x8x1xf32, #tpu.memory_space<vmem>>, %arg6: memref<1x8x320xf32, #tpu.memory_space<vmem>>, %arg7: memref<72x362xbf16, #tpu.memory_space<vmem>>, %arg8: memref<80x320xbf16, #tpu.memory_space<vmem>>, %arg9: memref<8x362xbf16, #tpu.memory_space<vmem>>) attributes {dimension_semantics = [#tpu.dimension_semantics<parallel>], iteration_bounds = array<i64: 2>, scalar_prefetch = 0 : i64, scratch_operands = 3 : i64, tpu.core_type = #tpu.core_type<tc>, window_params = [{transform_indices = @transform_0, window_bounds = array<i64: 1, 8, 404>}, {pipeline_mode = #tpu.pipeline_mode<synchronous>, transform_indices = @transform_1, window_bounds = array<i64: 8, 362>}, {pipeline_mode = #tpu.pipeline_mode<synchronous>, transform_indices = @transform_2, window_bounds = array<i64: 8, 72>}, {pipeline_mode = #tpu.pipeline_mode<synchronous>, transform_indices = @transform_3, window_bounds = array<i64: 8, 80>}, {pipeline_mode = #tpu.pipeline_mode<synchronous>, transform_indices = @transform_4, window_bounds = array<i64: 2, 8, 1>}, {transform_indices = @transform_5, window_bounds = array<i64: 1, 8, 320>}]} {
    %c0 = arith.constant 0 : index
    %c0_0 = arith.constant 0 : index
    %c0_1 = arith.constant 0 : index
    %0 = vector.load %arg1[%c0, %c0_0, %c0_1] : memref<1x8x404xbf16, #tpu.memory_space<vmem>>, vector<1x8x362xbf16>
    %1 = vector.shape_cast %0 : vector<1x8x362xbf16> to vector<8x362xbf16>
    %c0_2 = arith.constant 0 : index
    %c0_3 = arith.constant 0 : index
    %2 = vector.load %arg7[%c0_2, %c0_3] : memref<72x362xbf16, #tpu.memory_space<vmem>>, vector<8x362xbf16>
    tpu.vector_store %arg7[%c0_2, %c0_3], %1 {strides = array<i32>} : memref<72x362xbf16, #tpu.memory_space<vmem>>, vector<8x362xbf16>,
    %c0_4 = arith.constant 0 : index
    %c0_5 = arith.constant 0 : index
    %c1 = arith.constant 1 : index
    %3 = vector.load %arg1[%c0_4, %c0_5, %c1] : memref<1x8x404xbf16, #tpu.memory_space<vmem>>, vector<1x8x362xbf16>
    %4 = vector.shape_cast %3 : vector<1x8x362xbf16> to vector<8x362xbf16>
    %c8 = arith.constant 8 : index
    %c0_6 = arith.constant 0 : index
    %5 = vector.load %arg7[%c8, %c0_6] : memref<72x362xbf16, #tpu.memory_space<vmem>>, vector<8x362xbf16>
    tpu.vector_store %arg7[%c8, %c0_6], %4 {strides = array<i32>} : memref<72x362xbf16, #tpu.memory_space<vmem>>, vector<8x362xbf16>,
    %c0_7 = arith.constant 0 : index
    %c0_8 = arith.constant 0 : index
    %c2 = arith.constant 2 : index
    %6 = vector.load %arg1[%c0_7, %c0_8, %c2] : memref<1x8x404xbf16, #tpu.memory_space<vmem>>, vector<1x8x362xbf16>
    %7 = vector.shape_cast %6 : vector<1x8x362xbf16> to vector<8x362xbf16>
    %c16 = arith.constant 16 : index
    %c0_9 = arith.constant 0 : index
    %8 = vector.load %arg7[%c16, %c0_9] : memref<72x362xbf16, #tpu.memory_space<vmem>>, vector<8x362xbf16>
    tpu.vector_store %arg7[%c16, %c0_9], %7 {strides = array<i32>} : memref<72x362xbf16, #tpu.memory_space<vmem>>, vector<8x362xbf16>,
    %c0_10 = arith.constant 0 : index
    %c0_11 = arith.constant 0 : index
    %c20 = arith.constant 20 : index
    %9 = vector.load %arg1[%c0_10, %c0_11, %c20] : memref<1x8x404xbf16, #tpu.memory_space<vmem>>, vector<1x8x362xbf16>
    %10 = vector.shape_cast %9 : vector<1x8x362xbf16> to vector<8x362xbf16>
    %c24 = arith.constant 24 : index
    %c0_12 = arith.constant 0 : index
    %11 = vector.load %arg7[%c24, %c0_12] : memref<72x362xbf16, #tpu.memory_space<vmem>>, vector<8x362xbf16>
    tpu.vector_store %arg7[%c24, %c0_12], %10 {strides = array<i32>} : memref<72x362xbf16, #tpu.memory_space<vmem>>, vector<8x362xbf16>,
    %c0_13 = arith.constant 0 : index
    %c0_14 = arith.constant 0 : index
    %c21 = arith.constant 21 : index
    %12 = vector.load %arg1[%c0_13, %c0_14, %c21] : memref<1x8x404xbf16, #tpu.memory_space<vmem>>, vector<1x8x362xbf16>
    %13 = vector.shape_cast %12 : vector<1x8x362xbf16> to vector<8x362xbf16>
    %c32 = arith.constant 32 : index
    %c0_15 = arith.constant 0 : index
    %14 = vector.load %arg7[%c32, %c0_15] : memref<72x362xbf16, #tpu.memory_space<vmem>>, vector<8x362xbf16>
    tpu.vector_store %arg7[%c32, %c0_15], %13 {strides = array<i32>} : memref<72x362xbf16, #tpu.memory_space<vmem>>, vector<8x362xbf16>,
    %c0_16 = arith.constant 0 : index
    %c0_17 = arith.constant 0 : index
    %c22 = arith.constant 22 : index
    %15 = vector.load %arg1[%c0_16, %c0_17, %c22] : memref<1x8x404xbf16, #tpu.memory_space<vmem>>, vector<1x8x362xbf16>
    %16 = vector.shape_cast %15 : vector<1x8x362xbf16> to vector<8x362xbf16>
    %c40 = arith.constant 40 : index
    %c0_18 = arith.constant 0 : index
    %17 = vector.load %arg7[%c40, %c0_18] : memref<72x362xbf16, #tpu.memory_space<vmem>>, vector<8x362xbf16>
    tpu.vector_store %arg7[%c40, %c0_18], %16 {strides = array<i32>} : memref<72x362xbf16, #tpu.memory_space<vmem>>, vector<8x362xbf16>,
    %c0_19 = arith.constant 0 : index
    %c0_20 = arith.constant 0 : index
    %c40_21 = arith.constant 40 : index
    %18 = vector.load %arg1[%c0_19, %c0_20, %c40_21] : memref<1x8x404xbf16, #tpu.memory_space<vmem>>, vector<1x8x362xbf16>
    %19 = vector.shape_cast %18 : vector<1x8x362xbf16> to vector<8x362xbf16>
    %c48 = arith.constant 48 : index
    %c0_22 = arith.constant 0 : index
    %20 = vector.load %arg7[%c48, %c0_22] : memref<72x362xbf16, #tpu.memory_space<vmem>>, vector<8x362xbf16>
    tpu.vector_store %arg7[%c48, %c0_22], %19 {strides = array<i32>} : memref<72x362xbf16, #tpu.memory_space<vmem>>, vector<8x362xbf16>,
    %c0_23 = arith.constant 0 : index
    %c0_24 = arith.constant 0 : index
    %c41 = arith.constant 41 : index
    %21 = vector.load %arg1[%c0_23, %c0_24, %c41] : memref<1x8x404xbf16, #tpu.memory_space<vmem>>, vector<1x8x362xbf16>
    %22 = vector.shape_cast %21 : vector<1x8x362xbf16> to vector<8x362xbf16>
    %c56 = arith.constant 56 : index
    %c0_25 = arith.constant 0 : index
    %23 = vector.load %arg7[%c56, %c0_25] : memref<72x362xbf16, #tpu.memory_space<vmem>>, vector<8x362xbf16>
    tpu.vector_store %arg7[%c56, %c0_25], %22 {strides = array<i32>} : memref<72x362xbf16, #tpu.memory_space<vmem>>, vector<8x362xbf16>,
    %c0_26 = arith.constant 0 : index
    %c0_27 = arith.constant 0 : index
    %c42 = arith.constant 42 : index
    %24 = vector.load %arg1[%c0_26, %c0_27, %c42] : memref<1x8x404xbf16, #tpu.memory_space<vmem>>, vector<1x8x362xbf16>
    %25 = vector.shape_cast %24 : vector<1x8x362xbf16> to vector<8x362xbf16>
    %c64 = arith.constant 64 : index
    %c0_28 = arith.constant 0 : index
    %26 = vector.load %arg7[%c64, %c0_28] : memref<72x362xbf16, #tpu.memory_space<vmem>>, vector<8x362xbf16>
    tpu.vector_store %arg7[%c64, %c0_28], %25 {strides = array<i32>} : memref<72x362xbf16, #tpu.memory_space<vmem>>, vector<8x362xbf16>,
    %c0_29 = arith.constant 0 : index
    %c0_30 = arith.constant 0 : index
    %c42_31 = arith.constant 42 : index
    %27 = vector.load %arg1[%c0_29, %c0_30, %c42_31] : memref<1x8x404xbf16, #tpu.memory_space<vmem>>, vector<1x8x320xbf16>
    %28 = vector.shape_cast %27 : vector<1x8x320xbf16> to vector<8x320xbf16>
    %c72 = arith.constant 72 : index
    %c0_32 = arith.constant 0 : index
    %29 = vector.load %arg8[%c72, %c0_32] : memref<80x320xbf16, #tpu.memory_space<vmem>>, vector<8x320xbf16>
    tpu.vector_store %arg8[%c72, %c0_32], %28 {strides = array<i32>} : memref<80x320xbf16, #tpu.memory_space<vmem>>, vector<8x320xbf16>,
    %c0_33 = arith.constant 0 : index
    %c0_34 = arith.constant 0 : index
    %30 = vector.load %arg3[%c0_33, %c0_34] : memref<8x72xbf16, #tpu.memory_space<vmem>>, vector<8x72xbf16>
    %c0_35 = arith.constant 0 : index
    %c0_36 = arith.constant 0 : index
    %31 = vector.load %arg7[%c0_35, %c0_36] : memref<72x362xbf16, #tpu.memory_space<vmem>>, vector<72x362xbf16>
    %cst = arith.constant dense<0.000000e+00> : vector<8x362xf32>
    %32 = tpu.matmul %30, %31, %cst {dimension_numbers = #tpu.dot_dimension_numbers<[1], [0], [0], [1], [0, 0, 1, 1], [], []>} : vector<8x72xbf16>, vector<72x362xbf16>, vector<8x362xf32> -> vector<8x362xf32>
    %c0_37 = arith.constant 0 : index
    %c0_38 = arith.constant 0 : index
    %c0_39 = arith.constant 0 : index
    %33 = vector.load %arg5[%c0_37, %c0_38, %c0_39] : memref<2x8x1xf32, #tpu.memory_space<vmem>>, vector<1x8x1xf32>
    %34 = vector.shape_cast %33 : vector<1x8x1xf32> to vector<8x1xf32>
    %35 = vector.broadcast %34 : vector<8x1xf32> to vector<8x362xf32>
    %36 = arith.addf %32, %35 : vector<8x362xf32>
    %cst_40 = arith.constant 0.000000e+00 : f32
    %37 = vector.broadcast %cst_40 : f32 to vector<8x362xf32>
    %38 = arith.maximumf %36, %37 : vector<8x362xf32>
    %c0_41 = arith.constant 0 : index
    %c0_42 = arith.constant 0 : index
    %39 = vector.load %arg2[%c0_41, %c0_42] : memref<8x362xf32, #tpu.memory_space<vmem>>, vector<8x362xf32>
    %40 = arith.mulf %38, %39 : vector<8x362xf32>
    %41 = arith.truncf %40 : vector<8x362xf32> to vector<8x362xbf16>
    %c0_43 = arith.constant 0 : index
    %c0_44 = arith.constant 0 : index
    %42 = vector.load %arg9[%c0_43, %c0_44] : memref<8x362xbf16, #tpu.memory_space<vmem>>, vector<8x362xbf16>
    tpu.vector_store %arg9[%c0_43, %c0_44], %41 {strides = array<i32>} : memref<8x362xbf16, #tpu.memory_space<vmem>>, vector<8x362xbf16>,
    %c0_45 = arith.constant 0 : index
    %c0_46 = arith.constant 0 : index
    %43 = vector.load %arg9[%c0_45, %c0_46] : memref<8x362xbf16, #tpu.memory_space<vmem>>, vector<8x320xbf16>
    %c0_47 = arith.constant 0 : index
    %c0_48 = arith.constant 0 : index
    %44 = vector.load %arg8[%c0_47, %c0_48] : memref<80x320xbf16, #tpu.memory_space<vmem>>, vector<8x320xbf16>
    tpu.vector_store %arg8[%c0_47, %c0_48], %43 {strides = array<i32>} : memref<80x320xbf16, #tpu.memory_space<vmem>>, vector<8x320xbf16>,
    %c0_49 = arith.constant 0 : index
    %c1_50 = arith.constant 1 : index
    %45 = vector.load %arg9[%c0_49, %c1_50] : memref<8x362xbf16, #tpu.memory_space<vmem>>, vector<8x320xbf16>
    %c8_51 = arith.constant 8 : index
    %c0_52 = arith.constant 0 : index
    %46 = vector.load %arg8[%c8_51, %c0_52] : memref<80x320xbf16, #tpu.memory_space<vmem>>, vector<8x320xbf16>
    tpu.vector_store %arg8[%c8_51, %c0_52], %45 {strides = array<i32>} : memref<80x320xbf16, #tpu.memory_space<vmem>>, vector<8x320xbf16>,
    %c0_53 = arith.constant 0 : index
    %c2_54 = arith.constant 2 : index
    %47 = vector.load %arg9[%c0_53, %c2_54] : memref<8x362xbf16, #tpu.memory_space<vmem>>, vector<8x320xbf16>
    %c16_55 = arith.constant 16 : index
    %c0_56 = arith.constant 0 : index
    %48 = vector.load %arg8[%c16_55, %c0_56] : memref<80x320xbf16, #tpu.memory_space<vmem>>, vector<8x320xbf16>
    tpu.vector_store %arg8[%c16_55, %c0_56], %47 {strides = array<i32>} : memref<80x320xbf16, #tpu.memory_space<vmem>>, vector<8x320xbf16>,
    %c0_57 = arith.constant 0 : index
    %c20_58 = arith.constant 20 : index
    %49 = vector.load %arg9[%c0_57, %c20_58] : memref<8x362xbf16, #tpu.memory_space<vmem>>, vector<8x320xbf16>
    %c24_59 = arith.constant 24 : index
    %c0_60 = arith.constant 0 : index
    %50 = vector.load %arg8[%c24_59, %c0_60] : memref<80x320xbf16, #tpu.memory_space<vmem>>, vector<8x320xbf16>
    tpu.vector_store %arg8[%c24_59, %c0_60], %49 {strides = array<i32>} : memref<80x320xbf16, #tpu.memory_space<vmem>>, vector<8x320xbf16>,
    %c0_61 = arith.constant 0 : index
    %c21_62 = arith.constant 21 : index
    %51 = vector.load %arg9[%c0_61, %c21_62] : memref<8x362xbf16, #tpu.memory_space<vmem>>, vector<8x320xbf16>
    %c32_63 = arith.constant 32 : index
    %c0_64 = arith.constant 0 : index
    %52 = vector.load %arg8[%c32_63, %c0_64] : memref<80x320xbf16, #tpu.memory_space<vmem>>, vector<8x320xbf16>
    tpu.vector_store %arg8[%c32_63, %c0_64], %51 {strides = array<i32>} : memref<80x320xbf16, #tpu.memory_space<vmem>>, vector<8x320xbf16>,
    %c0_65 = arith.constant 0 : index
    %c22_66 = arith.constant 22 : index
    %53 = vector.load %arg9[%c0_65, %c22_66] : memref<8x362xbf16, #tpu.memory_space<vmem>>, vector<8x320xbf16>
    %c40_67 = arith.constant 40 : index
    %c0_68 = arith.constant 0 : index
    %54 = vector.load %arg8[%c40_67, %c0_68] : memref<80x320xbf16, #tpu.memory_space<vmem>>, vector<8x320xbf16>
    tpu.vector_store %arg8[%c40_67, %c0_68], %53 {strides = array<i32>} : memref<80x320xbf16, #tpu.memory_space<vmem>>, vector<8x320xbf16>,
    %c0_69 = arith.constant 0 : index
    %c40_70 = arith.constant 40 : index
    %55 = vector.load %arg9[%c0_69, %c40_70] : memref<8x362xbf16, #tpu.memory_space<vmem>>, vector<8x320xbf16>
    %c48_71 = arith.constant 48 : index
    %c0_72 = arith.constant 0 : index
    %56 = vector.load %arg8[%c48_71, %c0_72] : memref<80x320xbf16, #tpu.memory_space<vmem>>, vector<8x320xbf16>
    tpu.vector_store %arg8[%c48_71, %c0_72], %55 {strides = array<i32>} : memref<80x320xbf16, #tpu.memory_space<vmem>>, vector<8x320xbf16>,
    %c0_73 = arith.constant 0 : index
    %c41_74 = arith.constant 41 : index
    %57 = vector.load %arg9[%c0_73, %c41_74] : memref<8x362xbf16, #tpu.memory_space<vmem>>, vector<8x320xbf16>
    %c56_75 = arith.constant 56 : index
    %c0_76 = arith.constant 0 : index
    %58 = vector.load %arg8[%c56_75, %c0_76] : memref<80x320xbf16, #tpu.memory_space<vmem>>, vector<8x320xbf16>
    tpu.vector_store %arg8[%c56_75, %c0_76], %57 {strides = array<i32>} : memref<80x320xbf16, #tpu.memory_space<vmem>>, vector<8x320xbf16>,
    %c0_77 = arith.constant 0 : index
    %c42_78 = arith.constant 42 : index
    %59 = vector.load %arg9[%c0_77, %c42_78] : memref<8x362xbf16, #tpu.memory_space<vmem>>, vector<8x320xbf16>
    %c64_79 = arith.constant 64 : index
    %c0_80 = arith.constant 0 : index
    %60 = vector.load %arg8[%c64_79, %c0_80] : memref<80x320xbf16, #tpu.memory_space<vmem>>, vector<8x320xbf16>
    tpu.vector_store %arg8[%c64_79, %c0_80], %59 {strides = array<i32>} : memref<80x320xbf16, #tpu.memory_space<vmem>>, vector<8x320xbf16>,
    %c0_81 = arith.constant 0 : index
    %c0_82 = arith.constant 0 : index
    %61 = vector.load %arg4[%c0_81, %c0_82] : memref<8x80xbf16, #tpu.memory_space<vmem>>, vector<8x80xbf16>
    %c0_83 = arith.constant 0 : index
    %c0_84 = arith.constant 0 : index
    %62 = vector.load %arg8[%c0_83, %c0_84] : memref<80x320xbf16, #tpu.memory_space<vmem>>, vector<80x320xbf16>
    %cst_85 = arith.constant dense<0.000000e+00> : vector<8x320xf32>
    %63 = tpu.matmul %61, %62, %cst_85 {dimension_numbers = #tpu.dot_dimension_numbers<[1], [0], [0], [1], [0, 0, 1, 1], [], []>} : vector<8x80xbf16>, vector<80x320xbf16>, vector<8x320xf32> -> vector<8x320xf32>
    %c1_86 = arith.constant 1 : index
    %c0_87 = arith.constant 0 : index
    %c0_88 = arith.constant 0 : index
    %64 = vector.load %arg5[%c1_86, %c0_87, %c0_88] : memref<2x8x1xf32, #tpu.memory_space<vmem>>, vector<1x8x1xf32>
    %65 = vector.shape_cast %64 : vector<1x8x1xf32> to vector<8x1xf32>
    %66 = vector.broadcast %65 : vector<8x1xf32> to vector<8x320xf32>
    %67 = arith.addf %63, %66 : vector<8x320xf32>
    %cst_89 = arith.constant 0.000000e+00 : f32
    %68 = vector.broadcast %cst_89 : f32 to vector<8x320xf32>
    %69 = arith.maximumf %67, %68 : vector<8x320xf32>
    %c0_90 = arith.constant 0 : index
    %c0_91 = arith.constant 0 : index
    %c0_92 = arith.constant 0 : index
    %70 = vector.load %arg6[%c0_90, %c0_91, %c0_92] : memref<1x8x320xf32, #tpu.memory_space<vmem>>, vector<1x8x320xf32>
    %71 = vector.shape_cast %70 : vector<1x8x320xf32> to vector<8x320xf32>
    %72 = vector.shape_cast %69 : vector<8x320xf32> to vector<1x8x320xf32>
    tpu.vector_store %arg6[%c0_90, %c0_91, %c0_92], %72 {strides = array<i32>} : memref<1x8x320xf32, #tpu.memory_space<vmem>>, vector<1x8x320xf32>,
    return
  }
  func.func @transform_0(%arg0: i32) -> (i32, i32, i32) {
    %c0_i32 = arith.constant 0 : i32
    %c0_i32_0 = arith.constant 0 : i32
    %c0_i32_1 = arith.constant 0 : i32
    return %arg0, %c0_i32, %c0_i32_0 : i32, i32, i32
  }
  func.func @transform_1(%arg0: i32) -> (i32, i32) {
    %c0_i32 = arith.constant 0 : i32
    %c0_i32_0 = arith.constant 0 : i32
    %c0_i32_1 = arith.constant 0 : i32
    return %c0_i32, %c0_i32_0 : i32, i32
  }
  func.func @transform_2(%arg0: i32) -> (i32, i32) {
    %c0_i32 = arith.constant 0 : i32
    %c0_i32_0 = arith.constant 0 : i32
    %c0_i32_1 = arith.constant 0 : i32
    return %c0_i32, %c0_i32_0 : i32, i32
  }
  func.func @transform_3(%arg0: i32) -> (i32, i32) {
    %c0_i32 = arith.constant 0 : i32
    %c0_i32_0 = arith.constant 0 : i32
    %c0_i32_1 = arith.constant 0 : i32
    return %c0_i32, %c0_i32_0 : i32, i32
  }
  func.func @transform_4(%arg0: i32) -> (i32, i32, i32) {
    %c0_i32 = arith.constant 0 : i32
    %c0_i32_0 = arith.constant 0 : i32
    %c0_i32_1 = arith.constant 0 : i32
    %c0_i32_2 = arith.constant 0 : i32
    return %c0_i32, %c0_i32_0, %c0_i32_1 : i32, i32, i32
  }
  func.func @transform_5(%arg0: i32) -> (i32, i32, i32) {
    %c0_i32 = arith.constant 0 : i32
    %c0_i32_0 = arith.constant 0 : i32
    %c0_i32_1 = arith.constant 0 : i32
    return %arg0, %c0_i32, %c0_i32_0 : i32, i32, i32
  }
}

</mosaic_0001>

<bundles_post_ra>
// kernel: mul.29
= control target key start
LH: loop header
LB: loop body
LE: loop exit
PB: predicated region body
PF: predicated region fallthrough
CT: control target
= control target key end

     0   :  { %s46_s0 = inlined_call_operand.vmem [shape: f32[362], index: 0, kind: input, shape index: {}]   ;;  %s47_s1 = inlined_call_operand.vmem [shape: f32[8,362], index: 1, kind: output, shape index: {}]  }
   0x1   :  { %v4_v0 = vld [vmem:[%s46_s0] ss:$0 sm:$0xff]  ;;  %v14_v1 = vld [vmem:[%s46_s0 + $0x1] ss:$0 sm:$0xff]  ;;  %v16_v2 = vld [vmem:[%s46_s0 + $0x2] ss:$0 sm:$0xff] }
   0x2   :  { %5 = vst [vmem:[%s47_s1] sm:$0xff] %v4_v0 }
   0x3   :  { %15 = vst [vmem:[%s47_s1 + $0x8] sm:$0xff] %v14_v1 }
   0x4   :  { %17 = vst [vmem:[%s47_s1 + $0x10] sm:$0xff] %v16_v2 }

// kernel: resblock_pallas.1
= control target key start
LH: loop header
LB: loop body
LE: loop exit
PB: predicated region body
PF: predicated region fallthrough
CT: control target
= control target key end

     0   :  { %s1117_s18 = smov 0   ;;  %s1275_s0 = inlined_call_operand.vmem [shape: bf16[2,8,404], index: 0, kind: input, shape index: {}]   ;;  %s1276_s1 = inlined_call_operand.vmem [shape: f32[8,362], index: 1, kind: input, shape index: {}]   ;;  %s1277_s2 = inlined_call_operand.vmem [shape: bf16[8,72], index: 2, kind: input, shape index: {}]   ;;  %s1278_s3 = inlined_call_operand.vmem [shape: bf16[8,80], index: 3, kind: input, shape index: {}]   ;;  %s1279_s4 = inlined_call_operand.vmem [shape: f32[2,8,1], index: 4, kind: input, shape index: {}]   ;;  %s1280_s5 = inlined_call_operand.vmem [shape: f32[2,8,320], index: 5, kind: output, shape index: {}]  }
   0x1 LB: > { %s896_s19 = sadd.s32 4294967295, %s1076_s18   ;;  %p900_p0 = scmp.ge.s32.totalorder %s1076_s18, 1  ;;  %s1076_s18 = sphi %s1117_s18, %s15_s18  }
   0x2   : > { %p187_p1 = scmp.lt.s32.totalorder %s1076_s18, 3 }
   0x4   : > { %p188_p2 = pnand %p900_p0, %p187_p1 }
   0x5   : > { %p215_p3 = scmp.lt.s32.totalorder (!%p188_p2), %s896_s19, 1  ;;  %s1078_s24 = smov (!%p188_p2), 86  }
   0x6   : > { %191 = sbr.rel (%p188_p2) target bundleno = 633 (0x279), region = 40  ;;  %s1079_s25 = smov (!%p188_p2), 88  }
   0x7   : > { %s1080_s26 = smov (!%p188_p2), 87   ;;  %s1081_s27 = smov (!%p188_p2), 106  }
   0x8   : > { %s1082_s28 = smov (!%p188_p2), 107   ;;  %s1083_s29 = smov (!%p188_p2), 126  }
   0x9   : > { %s1084_s30 = smov (!%p188_p2), 108   ;;  %s1085_s6 = smov (!%p188_p2), 127  }
   0xb   : > { %s1282_s19 = smov (!%p215_p3, %s896_s19), 1  ;;  %vm364_vm0 = vcmask 703488   ;;  %vm328_vm1 = vcmask 719872   ;;  %vm241_vm2 = vcmask 1043456   ;;  %vm229_vm3 = vcmask 863232  }
   0xc   : > { %s1021_s20 = sshll.u32 %s1282_s19, 4  ;;  %vm346_vm4 = vcmask 711680   ;;  %vm294_vm5 = vcmask 875520   ;;  %vm311_vm6 = vcmask 867328   ;;  %vm277_vm7 = vcmask 883712  }
   0xd   : > { %s1131_s23 = scalar_lea.vmem %s1275_s0, %s1021_s20  ;;  %vm260_vm8 = vcmask 1031168   ;;  %vm485_vm9 = vcmask 588800   ;;  %vm243_vm10 = vcmask 1039360   ;;  %vm386_vm11 = vcmask 519168  }
   0xe   : > { %v354_v0 = vld [vmem:[%s1131_s23 + $0x8] sm:$0xff]  ;;  %v353_v1 = vld [vmem:[%s1131_s23] sm:$0xff]  ;;  %vm791_vm12 = vcmask 654336   ;;  %vm839_vm13 = vcmask 523264  }
   0xf   : > { %359 = vrot.lane.b32.xlu0 %v354_v0, %s1078_s24  ;;  %323 = vrot.lane.b32.xlu1 %v354_v0, %s1079_s25  ;;  %228 = vst [vmem:[#allocation2] sm:$0xff] %v353_v1  ;;  %v301_v2 = vld [vmem:[%s1131_s23 + $0x8] sm:$0xf] }
  0x10   : > { %321 = vrot.lane.b32.xlu2 %v353_v1, %s1079_s25  ;;  %v284_v3 = vld [vmem:[%s1131_s23 + $0x8] sm:$0xf] }
  0x11   : > { %v250_v4 = vld [vmem:[%s1131_s23 + $0x8] sm:$0xf] }
  0x12   : > { %v267_v5 = vld [vmem:[%s1131_s23 + $0x8] sm:$0xf] }
  0x13   : > { %v232_v6 = vld [vmem:[%s1131_s23 + $0x8] sm:$0xf] }
  0x14   : > { %v227_v21 = vld [vmem:[%s1131_s23 + $0x8] sm:$0xf] }
  0x15   : > { %230 = vst.msk [vmem:[#allocation2 + $0x8] sm:$0xf] %vm229_vm3, %v227_v21 }
  0x17   : > { %357 = vrot.lane.b32.xlu0 %v353_v1, %s1078_s24  ;;  %341 = vrot.lane.b32.xlu1 %v354_v0, %s1080_s26  ;;  %v407_v0 = vld [vmem:[%s1279_s4] sm:$0xff] }
  0x18   : > { %339 = vrot.lane.b32.xlu2 %v353_v1, %s1080_s26 }
  0x1f   : > { %306 = vrot.lane.b32.xlu1 %v301_v2, %s1081_s27  ;;  %289 = vrot.lane.b32.xlu0 %v284_v3, %s1082_s28  ;;  %v1086_v2 = vmov 0  }
  0x20   : > { %287 = vrot.lane.b32.xlu2 %v353_v1, %s1082_s28  ;;  %1067 = vset.pattern.permute.xlu1 %v1086_v2 }
  0x21   : > { %1068 = vset.pattern.permute.xlu2 %v1086_v2  ;;  %1069 = vset.pattern.permute.xlu0 %v1086_v2 }
  0x27   : > { %304 = vrot.lane.b32.xlu0 %v353_v1, %s1081_s27  ;;  %255 = vrot.lane.b32.xlu1 %v250_v4, %s1083_s29 }
  0x28   : > { %272 = vrot.lane.b32.xlu2 %v267_v5, %s1084_s30 }
  0x2f   : > { %270 = vrot.lane.b32.xlu1 %v353_v1, %s1084_s30  ;;  %253 = vrot.lane.b32.xlu0 %v353_v1, %s1083_s29 }
  0x30   : > { %237 = vrot.lane.b32.xlu2 %v232_v6, %s1085_s6 }
  0x37   : > { %235 = vrot.lane.b32.xlu0 %v353_v1, %s1085_s6  ;;  %410 = vperm.xlu1 %1067, %v407_v0  }
  0x38   : > { %375 = vrot.lane.b32.xlu2 %v353_v1, %s1078_s24 }
  0x6a   : > { %v322_v7 = vpop.permute.xlu2 %321 }
  0x6b   : > { %v325_v10 = vrot.slane %v322_v7, 4 }
  0x72   : > { %v340_v8 = vpop.permute.xlu2 %339 }
  0x73   : > { %v343_v20 = vrot.slane %v340_v8, 4 }
  0x7a   : > { %v288_v9 = vpop.permute.xlu2 %287 }
  0x7b   : > { %v291_v37 = vrot.slane %v288_v9, 4 }
  0x81   : > { %v360_v11 = vpop.permute.xlu0 %359  ;;  %v324_v12 = vpop.permute.xlu1 %323 }
  0x82   : > { %v362_v13 = vrot.slane %v360_v11, 4  ;;  %v326_v14 = vrot.slane %v324_v12, 4  ;;  %v1157_v15 = vpop.permute.xlu2 %272 }
  0x83   : > { %282 = vst.msk [vmem:[#allocation2 + $0x2c] sm:$0xf] %vm229_vm3, %v1157_v15  ;;  %v275_v5 = vrot.slane %v1157_v15, 4 }
  0x84   : > { %v366_v16 = vsel %vm364_vm0, %v360_v11, %v362_v13  ;;  %v330_v17 = vsel %vm328_vm1, %v324_v12, %v326_v14  ;;  %v327_v18 = vsel %vm241_vm2, %v325_v10, %v326_v14 }
  0x85   : > { %370 = vst.msk [vmem:[#allocation2 + $0x68] sm:$0xf] %vm229_vm3, %v366_v16  ;;  %v329_v19 = vsel %vm328_vm1, %v322_v7, %v327_v18 }
  0x86   : > { %334 = vst.msk [vmem:[#allocation2 + $0x50] sm:$0xf] %vm229_vm3, %v330_v17 }
  0x87   : > { %333 = vst [vmem:[#allocation2 + $0x48] sm:$0xff] %v329_v19 }
  0x89   : > { %v358_v22 = vpop.permute.xlu0 %357  ;;  %v342_v23 = vpop.permute.xlu1 %341 }
  0x8a   : > { %v361_v24 = vrot.slane %v358_v22, 4  ;;  %v344_v25 = vrot.slane %v342_v23, 4  ;;  %v1169_v26 = vpop.permute.xlu2 %237  ;;  %v1027_v4 = vld [vmem:[#allocation2 + $0x28] sm:$0xf0] }
  0x8b   : > { %248 = vst.msk [vmem:[#allocation2 + $0x14] sm:$0xf] %vm229_vm3, %v1169_v26 }
  0x8c   : > { %v363_v27 = vsel %vm241_vm2, %v361_v24, %v362_v13  ;;  %v348_v28 = vsel %vm346_vm4, %v342_v23, %v344_v25  ;;  %v345_v29 = vsel %vm241_vm2, %v343_v20, %v344_v25  ;;  %v406_v30 = vld [vmem:[#allocation2 + $0x68] sm:$0xf] }
  0x8d   : > { %v365_v31 = vsel %vm364_vm0, %v358_v22, %v363_v27  ;;  %352 = vst.msk [vmem:[#allocation2 + $0x5c] sm:$0xf] %vm229_vm3, %v348_v28  ;;  %v347_v32 = vsel %vm346_vm4, %v340_v8, %v345_v29  ;;  %v457_v33 = vunpack.c.l.b16 %v406_v30  ;;  %v950_v47 = vld [vmem:[#allocation2 + $0x50] sm:$0xf]  ;;  %v240_v27 = vrot.slane %v1169_v26, 4 }
  0x8e   : > { %v455_v34 = vunpack.c.l.b16 %v365_v31  ;;  %v456_v35 = vunpack.c.h.b16 %v365_v31  ;;  %351 = vst [vmem:[#allocation2 + $0x54] sm:$0xff] %v347_v32  ;;  %v942_v51 = vld [vmem:[#allocation2 + $0x48] sm:$0xf]  ;;  %v1031_v52 = vld [vmem:[#allocation2 + $0x4c] sm:$0xf] }
  0x8f   : > { %v472_v36 = vpack.c.b16 %v457_v33, %v457_v33  ;;  %v388_v29 = vld [vmem:[%s1277_s2] sm:$0xf] }
  0x90   : > { %v470_v38 = vpack.c.b16 %v455_v34, %v455_v34  ;;  %v471_v39 = vpack.c.b16 %v456_v35, %v456_v35 }
  0x91   : > { %v307_v40 = vpop.permute.xlu1 %306  ;;  %v290_v41 = vpop.permute.xlu0 %289  ;;  %v497_v42 = vsel %vm241_vm2, %v472_v36, 0 }
  0x92   : > { %316 = vst.msk [vmem:[#allocation2 + $0x44] sm:$0xf] %vm229_vm3, %v307_v40  ;;  %v292_v43 = vrot.slane %v290_v41, 4  ;;  %528 = vmatpush.bf16.msra.mxu2 %v497_v42  ;;  %v491_v44 = vsel %vm241_vm2, %v470_v38, 0  ;;  %v494_v45 = vsel %vm241_vm2, %v471_v39, 0  ;;  %v309_v60 = vrot.slane %v307_v40, 4 }
  0x93   : > { %299 = vst.msk [vmem:[#allocation2 + $0x38] sm:$0xf] %vm229_vm3, %v290_v41  ;;  %502 = vmatpush.bf16.msra.mxu0 %v491_v44  ;;  %515 = vmatpush.bf16.msra.mxu1 %v494_v45  ;;  %v1024_v14 = vld [vmem:[#allocation2 + $0x10] sm:$0xf0]  ;;  %v906_v38 = vld [vmem:[#allocation2] sm:$0xf] }
  0x94   : > { %v293_v46 = vsel %vm241_vm2, %v291_v37, %v292_v43  ;;  %v1033_v48 = vld [vmem:[#allocation2 + $0x58] sm:$0xf0]  ;;  %v1022_v39 = vld [vmem:[#allocation2 + $0x4] sm:$0xf]  ;;  %v372_v44 = vld [vmem:[%s1131_s23 + $0x8] sm:$0xf] }
  0x95   : > { %v295_v49 = vsel %vm294_vm5, %v288_v9, %v293_v46  ;;  %v951_v50 = vor.u32 %v1033_v48, %v950_v47  ;;  %v1032_v53 = vld [vmem:[#allocation2 + $0x50] sm:$0xf0]  ;;  %v944_v54 = vld [vmem:[#allocation2 + $0x54] sm:$0xf0]  ;;  %v914_v9 = vld [vmem:[#allocation2 + $0x8] sm:$0xf]  ;;  %377 = vrot.lane.b32.xlu0 %v372_v44, %s1078_s24 }
  0x96   : > { %298 = vst [vmem:[#allocation2 + $0x30] sm:$0xff] %v295_v49  ;;  %v943_v55 = vor.u32 %v1032_v53, %v942_v51  ;;  %v947_v56 = vor.u32 %v1031_v52, %v944_v54  ;;  %v915_v23 = vor.u32 %v1024_v14, %v914_v9  ;;  %v543_v48 = vld [vmem:[%s1276_s1 + $0x10] sm:$0xff]  ;;  %s1049_s23 = smul.u32 24, %s1282_s19 }
  0x97   : > { %529 = vmatpush.bf16.msra.mxu2 %v951_v50 }
  0x98   : > { %503 = vmatpush.bf16.msra.mxu0 %v943_v55  ;;  %516 = vmatpush.bf16.msra.mxu1 %v947_v56 }
  0x99   : > { %v305_v57 = vpop.permute.xlu0 %304  ;;  %v256_v58 = vpop.permute.xlu1 %255  ;;  %v1030_v59 = vld [vmem:[#allocation2 + $0x40] sm:$0xf0] }
  0x9a   : > { %v308_v61 = vrot.slane %v305_v57, 4  ;;  %265 = vst.msk [vmem:[#allocation2 + $0x20] sm:$0xf] %vm229_vm3, %v256_v58  ;;  %v938_v62 = vld [vmem:[#allocation2 + $0x38] sm:$0xf]  ;;  %v258_v10 = vrot.slane %v256_v58, 4 }
  0x9b   : > { %v939_v63 = vor.u32 %v1030_v59, %v938_v62  ;;  %v542_v58 = vld [vmem:[%s1276_s1 + $0x8] sm:$0xff] }
  0x9c   : > { %v310_v1 = vsel %vm241_vm2, %v308_v61, %v309_v60 }
  0x9d   : > { %v312_v3 = vsel %vm311_vm6, %v305_v57, %v310_v1  ;;  %530 = vmatpush.bf16.msra.mxu2 %v939_v63  ;;  %v930_v18 = vld [vmem:[#allocation2 + $0x30] sm:$0xf]  ;;  %v1028_v21 = vld [vmem:[#allocation2 + $0x34] sm:$0xf]  ;;  %v541_v57 = vld [vmem:[%s1276_s1] sm:$0xff] }
  0x9e   : > { %315 = vst [vmem:[#allocation2 + $0x3c] sm:$0xff] %v312_v3 }
  0xa1   : > { %v271_v6 = vpop.permute.xlu1 %270  ;;  %v254_v7 = vpop.permute.xlu0 %253  ;;  %v926_v8 = vld [vmem:[#allocation2 + $0x20] sm:$0xf] }
  0xa2   : > { %v274_v11 = vrot.slane %v271_v6, 4  ;;  %v257_v12 = vrot.slane %v254_v7, 4  ;;  %v927_v13 = vor.u32 %v1027_v4, %v926_v8 }
  0xa4   : > { %v276_v16 = vsel %vm241_vm2, %v274_v11, %v275_v5  ;;  %v259_v17 = vsel %vm241_vm2, %v257_v12, %v258_v10  ;;  %531 = vmatpush.bf16.msra.mxu2 %v927_v13  ;;  %v376_v11 = vpop.permute.xlu2 %375 }
  0xa5   : > { %v278_v19 = vsel %vm277_vm7, %v271_v6, %v276_v16  ;;  %v261_v15 = vsel %vm260_vm8, %v254_v7, %v259_v17  ;;  %v1029_v20 = vld [vmem:[#allocation2 + $0x38] sm:$0xf0]  ;;  %v932_v22 = vld [vmem:[#allocation2 + $0x3c] sm:$0xf0]  ;;  %v379_v12 = vrot.slane %v376_v11, 4 }
  0xa6   : > { %281 = vst [vmem:[#allocation2 + $0x24] sm:$0xff] %v278_v19  ;;  %v931_v24 = vor.u32 %v1029_v20, %v930_v18  ;;  %v935_v25 = vor.u32 %v1028_v21, %v932_v22 }
  0xa7   : > { %264 = vst [vmem:[#allocation2 + $0x18] sm:$0xff] %v261_v15 }
  0xa8   : > { %504 = vmatpush.bf16.msra.mxu0 %v931_v24  ;;  %517 = vmatpush.bf16.msra.mxu1 %v935_v25 }
  0xa9   : > { %v236_v28 = vpop.permute.xlu0 %235  ;;  %532 = vmatpush.bf16.msra.mxu2 %v915_v23  ;;  %v411_v45 = vpop.permute.xlu1 %410 }
  0xaa   : > { %v239_v30 = vrot.slane %v236_v28, 4 }
  0xac   : > { %v242_v31 = vsel %vm241_vm2, %v239_v30, %v240_v27  ;;  %954 = vmatmul.msk.bf16.vlgmr.msra.gmra.mxu2 %vm485_vm9, %v388_v29 }
  0xad   : > { %v244_v32 = vsel %vm243_vm10, %v236_v28, %v242_v31  ;;  %v1026_v33 = vld [vmem:[#allocation2 + $0x20] sm:$0xf0]  ;;  %v920_v34 = vld [vmem:[#allocation2 + $0x24] sm:$0xf0] }
  0xae   : > { %247 = vst [vmem:[#allocation2 + $0xc] sm:$0xff] %v244_v32  ;;  %v918_v26 = vld [vmem:[#allocation2 + $0x18] sm:$0xf]  ;;  %v1025_v35 = vld [vmem:[#allocation2 + $0x1c] sm:$0xf] }
  0xaf   : > { %v919_v36 = vor.u32 %v1026_v33, %v918_v26  ;;  %v923_v37 = vor.u32 %v1025_v35, %v920_v34 }
  0xb1   : > { %505 = vmatpush.bf16.msra.mxu0 %v919_v36  ;;  %518 = vmatpush.bf16.msra.mxu1 %v923_v37 }
  0xb5   : > { %v1023_v40 = vld [vmem:[#allocation2 + $0x8] sm:$0xf0]  ;;  %v908_v41 = vld [vmem:[#allocation2 + $0xc] sm:$0xf0] }
  0xb6   : > { %v907_v42 = vor.u32 %v1023_v40, %v906_v38  ;;  %v911_v43 = vor.u32 %v1022_v39, %v908_v41 }
  0xb8   : > { %506 = vmatpush.bf16.msra.mxu0 %v907_v42  ;;  %519 = vmatpush.bf16.msra.mxu1 %v911_v43 }
  0xbb   : > { %952 = vmatmul.msk.bf16.vlgmr.msra.gmra.mxu0 %vm485_vm9, %v388_v29  ;;  %953 = vmatmul.msk.bf16.vlgmr.msra.gmra.mxu1 %vm485_vm9, %v388_v29 }
 0x107   : > { %v378_v13 = vpop.permute.xlu0 %377 }
 0x108   : > { %v380_v14 = vrot.slane %v378_v13, 4  ;;  %387 = vst.msk [vmem:[#allocation3 + $0x74] sm:$0xf] %vm386_vm11, %v378_v13 }
 0x10a   : > { %v381_v16 = vsel %vm241_vm2, %v379_v12, %v380_v14 }
 0x10b   : > { %v382_v17 = vsel %vm364_vm0, %v376_v11, %v381_v16 }
 0x10c   : > { %385 = vst [vmem:[#allocation3 + $0x6c] sm:$0xff] %v382_v17 }
 0x10f   : > { %v1048_v20 = vld [vmem:[#allocation3 + $0x70] sm:$0xf0] }
 0x113   : > { %v1047_v36 = vld [vmem:[#allocation3 + $0x68] sm:$0xf0]  ;;  %v1008_v40 = vld [vmem:[#allocation3 + $0x6c] sm:$0xf0] }
 0x12f   : > { %v534_v46 = vpop.f32.mrf.mxu2 }
 0x130   : > { %v535_v47 = vadd.f32 %v534_v46, %v411_v45 }
 0x132   : > { %v540_v49 = vmax.f32 %v535_v47, 0.0 }
 0x134   : > { %v546_v50 = vmul.f32 %v543_v48, %v540_v49 }
 0x136   : > { %v548_v51 = vpack.c.bf16 %v546_v50, %v546_v50 }
 0x137   : > { %v536_v52 = vpop.f32.mrf.mxu2 }
 0x138   : > { %v508_v53 = vpop.f32.mrf.mxu0  ;;  %v521_v54 = vpop.f32.mrf.mxu1  ;;  %550 = vst.msk [vmem:[#allocation4 + $0x8] sm:$0xf] %vm229_vm3, %v548_v51 }
 0x139   : > { %v509_v55 = vadd.f32 %v508_v53, %v411_v45  ;;  %v522_v56 = vadd.f32 %v521_v54, %v411_v45 }
 0x13b   : > { %v538_v59 = vmax.f32 %v509_v55, 0.0  ;;  %v539_v60 = vmax.f32 %v522_v56, 0.0 }
 0x13d   : > { %v544_v61 = vmul.f32 %v541_v57, %v538_v59  ;;  %v545_v62 = vmul.f32 %v542_v58, %v539_v60  ;;  %v955_v59 = vld [vmem:[%s1279_s4 + $0x8] sm:$0xff] }
 0x13f   : > { %v547_v63 = vpack.c.bf16 %v545_v62, %v544_v61  ;;  %v552_v2 = vld [vmem:[#allocation4 + $0x8] sm:$0xf] }
 0x140   : > { %v510_v0 = vpop.f32.mrf.mxu0  ;;  %v523_v1 = vpop.f32.mrf.mxu1  ;;  %554 = vst.msk [vmem:[#allocation3 + $0x8] sm:$0xf] %vm386_vm11, %v552_v2  ;;  %v668_v3 = vld [vmem:[#allocation4 + $0x8] sm:$0xf] }
 0x141   : > { %671 = vrot.lane.b32.xlu1 %v547_v63, %s1078_s24  ;;  %655 = vrot.lane.b32.xlu2 %v547_v63, %s1080_s26  ;;  %553 = vst [vmem:[#allocation3] sm:$0xff] %v547_v63  ;;  %v652_v4 = vld [vmem:[#allocation4 + $0x8] sm:$0xf] }
 0x142   : > { %639 = vrot.lane.b32.xlu0 %v547_v63, %s1079_s25  ;;  %v636_v5 = vld [vmem:[#allocation4 + $0x8] sm:$0xf] }
 0x143   : > { %v604_v6 = vld [vmem:[#allocation4 + $0x8] sm:$0xf] }
 0x144   : > { %v572_v7 = vld [vmem:[#allocation4 + $0x8] sm:$0xf] }
 0x145   : > { %v620_v8 = vld [vmem:[#allocation4 + $0x8] sm:$0xf] }
 0x146   : > { %v588_v9 = vld [vmem:[#allocation4 + $0x8] sm:$0xf] }
 0x147   : > { %v556_v10 = vld [vmem:[#allocation4 + $0x8] sm:$0xf] }
 0x149   : > { %607 = vrot.lane.b32.xlu1 %v547_v63, %s1082_s28  ;;  %575 = vrot.lane.b32.xlu2 %v547_v63, %s1083_s29 }
 0x14a   : > { %623 = vrot.lane.b32.xlu0 %v547_v63, %s1081_s27 }
 0x151   : > { %591 = vrot.lane.b32.xlu1 %v547_v63, %s1084_s30  ;;  %673 = vrot.lane.b32.xlu2 %v668_v3, %s1078_s24 }
 0x152   : > { %657 = vrot.lane.b32.xlu0 %v652_v4, %s1080_s26  ;;  %s224_s26 = scalar_lea.vmem %s1280_s5, %s1049_s23 }
 0x159   : > { %641 = vrot.lane.b32.xlu1 %v636_v5, %s1079_s25  ;;  %609 = vrot.lane.b32.xlu2 %v604_v6, %s1082_s28 }
 0x15a   : > { %577 = vrot.lane.b32.xlu0 %v572_v7, %s1083_s29 }
 0x161   : > { %625 = vrot.lane.b32.xlu1 %v620_v8, %s1081_s27  ;;  %593 = vrot.lane.b32.xlu2 %v588_v9, %s1084_s30 }
 0x162   : > { %559 = vrot.lane.b32.xlu0 %v547_v63, %s1085_s6 }
 0x169   : > { %561 = vrot.lane.b32.xlu1 %v556_v10, %s1085_s6  ;;  %708 = vperm.xlu2 %1068, %v955_v59  }
 0x19b   : > { %v656_v18 = vpop.permute.xlu2 %655 }
 0x19c   : > { %v659_v47 = vrot.slane %v656_v18, 4 }
 0x1a3   : > { %v576_v19 = vpop.permute.xlu2 %575 }
 0x1a4   : > { %v579_v57 = vrot.slane %v576_v19, 4 }
 0x1ab   : > { %v674_v15 = vpop.permute.xlu2 %673 }
 0x1ac   : > { %682 = vst.msk [vmem:[#allocation3 + $0x68] sm:$0xf] %vm386_vm11, %v674_v15  ;;  %v676_v24 = vrot.slane %v674_v15, 4 }
 0x1b3   : > { %v672_v21 = vpop.permute.xlu1 %671  ;;  %v610_v22 = vpop.permute.xlu2 %609  ;;  %v1014_v23 = vld [vmem:[#allocation3 + $0x68] sm:$0xf] }
 0x1b4   : > { %v675_v25 = vrot.slane %v672_v21, 4  ;;  %v640_v27 = vpop.permute.xlu0 %639  ;;  %618 = vst.msk [vmem:[#allocation3 + $0x38] sm:$0xf] %vm386_vm11, %v610_v22  ;;  %v1015_v28 = vor.u32 %v1048_v20, %v1014_v23  ;;  %v612_v33 = vrot.slane %v610_v22, 4 }
 0x1b5   : > { %v643_v54 = vrot.slane %v640_v27, 4 }
 0x1b6   : > { %v677_v29 = vsel %vm241_vm2, %v675_v25, %v676_v24  ;;  %824 = vmatpush.bf16.msrb.mxu1 %v1015_v28 }
 0x1b7   : > { %v678_v30 = vsel %vm364_vm0, %v672_v21, %v677_v29 }
 0x1b8   : > { %681 = vst [vmem:[#allocation3 + $0x60] sm:$0xff] %v678_v30 }
 0x1bb   : > { %v608_v31 = vpop.permute.xlu1 %607  ;;  %v594_v32 = vpop.permute.xlu2 %593  ;;  %v990_v17 = vld [vmem:[#allocation3 + $0x38] sm:$0xf] }
 0x1bc   : > { %v624_v34 = vpop.permute.xlu0 %623  ;;  %v611_v26 = vrot.slane %v608_v31, 4  ;;  %602 = vst.msk [vmem:[#allocation3 + $0x2c] sm:$0xf] %vm386_vm11, %v594_v32  ;;  %v596_v44 = vrot.slane %v594_v32, 4 }
 0x1bd   : > { %v627_v3 = vrot.slane %v624_v34, 4 }
 0x1be   : > { %v613_v35 = vsel %vm241_vm2, %v611_v26, %v612_v33  ;;  %v966_v26 = vld [vmem:[#allocation3 + $0x8] sm:$0xf] }
 0x1bf   : > { %v614_v37 = vsel %vm294_vm5, %v608_v31, %v613_v35  ;;  %v1006_v38 = vld [vmem:[#allocation3 + $0x60] sm:$0xf]  ;;  %v1046_v39 = vld [vmem:[#allocation3 + $0x64] sm:$0xf] }
 0x1c0   : > { %617 = vst [vmem:[#allocation3 + $0x30] sm:$0xff] %v614_v37  ;;  %v1007_v41 = vor.u32 %v1047_v36, %v1006_v38  ;;  %v1011_v42 = vor.u32 %v1046_v39, %v1008_v40 }
 0x1c2   : > { %798 = vmatpush.bf16.msra.mxu3 %v1007_v41  ;;  %811 = vmatpush.bf16.msrb.mxu0 %v1011_v42  ;;  %v958_v41 = vld [vmem:[#allocation3] sm:$0xf] }
 0x1c3   : > { %v592_v43 = vpop.permute.xlu1 %591  ;;  %v1039_v31 = vld [vmem:[#allocation3 + $0x28] sm:$0xf0] }
 0x1c4   : > { %v658_v45 = vpop.permute.xlu0 %657  ;;  %v595_v46 = vrot.slane %v592_v43, 4 }
 0x1c5   : > { %v660_v48 = vrot.slane %v658_v45, 4  ;;  %666 = vst.msk [vmem:[#allocation3 + $0x5c] sm:$0xf] %vm386_vm11, %v658_v45 }
 0x1c6   : > { %v597_v49 = vsel %vm241_vm2, %v595_v46, %v596_v44 }
 0x1c7   : > { %v661_v50 = vsel %vm241_vm2, %v659_v47, %v660_v48  ;;  %v598_v51 = vsel %vm277_vm7, %v592_v43, %v597_v49  ;;  %v982_v22 = vld [vmem:[#allocation3 + $0x30] sm:$0xf]  ;;  %v1034_v43 = vld [vmem:[#allocation3 + $0x4] sm:$0xf]  ;;  %v683_v47 = vld [vmem:[%s1278_s3] sm:$0xf]  ;;  %v709_v48 = vpop.permute.xlu2 %708 }
 0x1c8   : > { %v662_v52 = vsel %vm346_vm4, %v656_v18, %v661_v50  ;;  %601 = vst [vmem:[#allocation3 + $0x24] sm:$0xff] %v598_v51 }
 0x1c9   : > { %665 = vst [vmem:[#allocation3 + $0x54] sm:$0xff] %v662_v52 }
 0x1cb   : > { %v642_v53 = vpop.permute.xlu1 %641 }
 0x1cc   : > { %v578_v55 = vpop.permute.xlu0 %577  ;;  %v644_v56 = vrot.slane %v642_v53, 4  ;;  %650 = vst.msk [vmem:[#allocation3 + $0x50] sm:$0xf] %vm386_vm11, %v642_v53  ;;  %v1045_v2 = vld [vmem:[#allocation3 + $0x58] sm:$0xf0] }
 0x1cd   : > { %v580_v58 = vrot.slane %v578_v55, 4  ;;  %586 = vst.msk [vmem:[#allocation3 + $0x20] sm:$0xf] %vm386_vm11, %v578_v55 }
 0x1ce   : > { %v645_v60 = vsel %vm241_vm2, %v643_v54, %v644_v56 }
 0x1cf   : > { %v581_v61 = vsel %vm241_vm2, %v579_v57, %v580_v58  ;;  %v646_v62 = vsel %vm328_vm1, %v640_v27, %v645_v60  ;;  %v1040_v27 = vld [vmem:[#allocation3 + $0x34] sm:$0xf]  ;;  %v1038_v35 = vld [vmem:[#allocation3 + $0x20] sm:$0xf0]  ;;  %v972_v36 = vld [vmem:[#allocation3 + $0x24] sm:$0xf0] }
 0x1d0   : > { %v582_v63 = vsel %vm260_vm8, %v576_v19, %v581_v61  ;;  %649 = vst [vmem:[#allocation3 + $0x48] sm:$0xff] %v646_v62  ;;  %v1044_v7 = vld [vmem:[#allocation3 + $0x50] sm:$0xf0]  ;;  %v996_v11 = vld [vmem:[#allocation3 + $0x54] sm:$0xf0] }
 0x1d1   : > { %585 = vst [vmem:[#allocation3 + $0x18] sm:$0xff] %v582_v63 }
 0x1d3   : > { %v626_v0 = vpop.permute.xlu1 %625  ;;  %v1002_v1 = vld [vmem:[#allocation3 + $0x50] sm:$0xf] }
 0x1d4   : > { %v628_v4 = vrot.slane %v626_v0, 4  ;;  %634 = vst.msk [vmem:[#allocation3 + $0x44] sm:$0xf] %vm386_vm11, %v626_v0  ;;  %v1003_v5 = vor.u32 %v1045_v2, %v1002_v1  ;;  %v560_v14 = vpop.permute.xlu0 %559  ;;  %v978_v23 = vld [vmem:[#allocation3 + $0x20] sm:$0xf] }
 0x1d5   : > { %v563_v19 = vrot.slane %v560_v14, 4  ;;  %v979_v32 = vor.u32 %v1039_v31, %v978_v23 }
 0x1d6   : > { %v629_v6 = vsel %vm241_vm2, %v627_v3, %v628_v4  ;;  %825 = vmatpush.bf16.msrb.mxu1 %v1003_v5 }
 0x1d7   : > { %v630_v8 = vsel %vm311_vm6, %v624_v34, %v629_v6  ;;  %v994_v9 = vld [vmem:[#allocation3 + $0x48] sm:$0xf]  ;;  %v1043_v10 = vld [vmem:[#allocation3 + $0x4c] sm:$0xf] }
 0x1d8   : > { %633 = vst [vmem:[#allocation3 + $0x3c] sm:$0xff] %v630_v8  ;;  %v995_v12 = vor.u32 %v1044_v7, %v994_v9  ;;  %v999_v13 = vor.u32 %v1043_v10, %v996_v11  ;;  %v970_v33 = vld [vmem:[#allocation3 + $0x18] sm:$0xf]  ;;  %v1037_v34 = vld [vmem:[#allocation3 + $0x1c] sm:$0xf] }
 0x1d9   : > { %v971_v38 = vor.u32 %v1038_v35, %v970_v33  ;;  %v975_v39 = vor.u32 %v1037_v34, %v972_v36 }
 0x1da   : > { %799 = vmatpush.bf16.msra.mxu3 %v995_v12  ;;  %812 = vmatpush.bf16.msrb.mxu0 %v999_v13 }
 0x1db   : > { %v562_v16 = vpop.permute.xlu1 %561  ;;  %v1042_v18 = vld [vmem:[#allocation3 + $0x40] sm:$0xf0] }
 0x1dc   : > { %v564_v15 = vrot.slane %v562_v16, 4  ;;  %570 = vst.msk [vmem:[#allocation3 + $0x14] sm:$0xf] %vm386_vm11, %v562_v16  ;;  %v991_v20 = vor.u32 %v1042_v18, %v990_v17 }
 0x1de   : > { %v565_v21 = vsel %vm241_vm2, %v563_v19, %v564_v15  ;;  %826 = vmatpush.bf16.msrb.mxu1 %v991_v20 }
 0x1df   : > { %v566_v24 = vsel %vm243_vm10, %v560_v14, %v565_v21  ;;  %v1041_v25 = vld [vmem:[#allocation3 + $0x38] sm:$0xf0]  ;;  %v984_v28 = vld [vmem:[#allocation3 + $0x3c] sm:$0xf0] }
 0x1e0   : > { %569 = vst [vmem:[#allocation3 + $0xc] sm:$0xff] %v566_v24  ;;  %v983_v29 = vor.u32 %v1041_v25, %v982_v22  ;;  %v987_v30 = vor.u32 %v1040_v27, %v984_v28 }
 0x1e2   : > { %800 = vmatpush.bf16.msra.mxu3 %v983_v29  ;;  %813 = vmatpush.bf16.msrb.mxu0 %v987_v30 }
 0x1e3   : > { %827 = vmatpush.bf16.msrb.mxu1 %v979_v32  ;;  %v1036_v37 = vld [vmem:[#allocation3 + $0x10] sm:$0xf0] }
 0x1e4   : > { %v967_v40 = vor.u32 %v1036_v37, %v966_v26 }
 0x1e6   : > { %801 = vmatpush.bf16.msra.mxu3 %v971_v38  ;;  %814 = vmatpush.bf16.msrb.mxu0 %v975_v39 }
 0x1e7   : > { %828 = vmatpush.bf16.msrb.mxu1 %v967_v40  ;;  %v1035_v42 = vld [vmem:[#allocation3 + $0x8] sm:$0xf0]  ;;  %v960_v44 = vld [vmem:[#allocation3 + $0xc] sm:$0xf0] }
 0x1e8   : > { %v959_v45 = vor.u32 %v1035_v42, %v958_v41  ;;  %v963_v46 = vor.u32 %v1034_v43, %v960_v44 }
 0x1ea   : > { %802 = vmatpush.bf16.msra.mxu3 %v959_v45  ;;  %815 = vmatpush.bf16.msrb.mxu0 %v963_v46 }
 0x1eb   : > { %1018 = vmatmul.msk.bf16.vlgmr.msrb.gmra.mxu1 %vm791_vm12, %v683_v47 }
 0x1ed   : > { %1016 = vmatmul.msk.bf16.vlgmr.msra.gmra.mxu3 %vm791_vm12, %v683_v47  ;;  %1017 = vmatmul.msk.bf16.vlgmr.msrb.gmra.mxu0 %vm791_vm12, %v683_v47 }
 0x268   : > { %v830_v49 = vpop.f32.mrf.mxu1 }
 0x269   : > { %v831_v50 = vadd.f32 %v830_v49, %v709_v48 }
 0x26a   : > { %v817_v51 = vpop.f32.mrf.mxu0 }
 0x26b   : > { %v818_v52 = vadd.f32 %v817_v51, %v709_v48  ;;  %v836_v53 = vmax.f32 %v831_v50, 0.0 }
 0x26d   : > { %v835_v54 = vmax.f32 %v818_v52, 0.0  ;;  %840 = vst.msk [vmem:[%s224_s26 + $0x10] sm:$0xff] %vm839_vm13, %v836_v53 }
 0x26f   : > { %838 = vst [vmem:[%s224_s26 + $0x8] sm:$0xff] %v835_v54 }
 0x270   : > { %v832_v55 = vpop.f32.mrf.mxu1  ;;  %v804_v56 = vpop.f32.mrf.mxu3 }
 0x271   : > { %v805_v57 = vadd.f32 %v804_v56, %v709_v48 }
 0x272   : > { %v819_v58 = vpop.f32.mrf.mxu0 }
 0x273   : > { %v834_v59 = vmax.f32 %v805_v57, 0.0 }
 0x275   : > { %837 = vst [vmem:[%s224_s26] sm:$0xff] %v834_v59 }
 0x278   : > { %v806_v60 = vpop.f32.mrf.mxu3 }
 0x279 PF: > { %s15_s18 = sadd.s32 1, %s1076_s18  }
 0x27a   : > { %p12_p4 = scmp.ge.s32.totalorder %s15_s18, 4  }
 0x27c   :  { %14 = sbr.rel (!%p12_p4) target bundleno = 1 (0x1), region = 71 }

</bundles_post_ra>
